<compile_context>
chip_gen: v7x
topology: tpu7x:2x2x1
jax: 0.10.0
libtpu: 0.0.40
codegen_flags: <defaults>
</compile_context>

<pallas_src>
import jax
import jax.numpy as jnp
from jax.experimental import pallas as pl
from jax.experimental.pallas import tpu as pltpu

LANE = 128
MAX_TILE_ROWS = 2048        # 2048 x 128 f32 = 1 MiB per input block
NUM_CORE_SPLITS = 2         # v7x megacore split; harmless on v5e/v6e
SMOOTH = 1e-5


def _accumulate(o_ref, p, t):
    # Lane-resident partial sums: only a sublane (axis 0) reduction per step.
    o_ref[0:1, :] += jnp.sum(p * t, axis=0, keepdims=True)
    o_ref[1:2, :] += jnp.sum(p + t, axis=0, keepdims=True)


def _dice_kernel(nrows_ref, p_ref, t_ref, o_ref):
    c = pl.program_id(0)            # core-split axis ("parallel")
    i = pl.program_id(1)            # sequential row-block axis ("arbitrary")

    @pl.when(i == 0)
    def _():
        o_ref[...] = jnp.zeros_like(o_ref)

    tile_rows = p_ref.shape[0]
    nrows = nrows_ref[0]
    row0 = (c * pl.num_programs(1) + i) * tile_rows   # unclamped global row

    full_block = row0 + tile_rows <= nrows

    @pl.when(full_block)
    def _():
        _accumulate(o_ref,
                    p_ref[...].astype(jnp.float32),
                    t_ref[...].astype(jnp.float32))

    @pl.when(jnp.logical_not(full_block))
    def _():
        # Boundary (or fully over-range) block: mask out-of-range rows.
        row_ids = jax.lax.broadcasted_iota(jnp.int32, p_ref.shape, 0) + row0
        valid = row_ids < nrows
        p = jnp.where(valid, p_ref[...].astype(jnp.float32), 0.0)
        t = jnp.where(valid, t_ref[...].astype(jnp.float32), 0.0)
        _accumulate(o_ref, p, t)


def _min_sublane(dtype):
    # Min second-to-last tile dim: f32 -> 8, bf16 -> 16, int8/bool/fp8 -> 32.
    bits = jnp.dtype(dtype).itemsize * 8
    return max(8, 256 // bits)


def dice_loss(y_pred, y_true):
    """Pallas implementation of DiceLoss.forward.  Returns a scalar f32."""
    p = jnp.reshape(y_pred, (-1,))
    t = jnp.reshape(y_true, (-1,))
    n = p.shape[0]

    # Only pad the (rare) non-lane-aligned tail; zero padding is sum-neutral.
    rem = (-n) % LANE
    if rem:
        p = jnp.pad(p, (0, rem))
        t = jnp.pad(t, (0, rem))
    rows = (n + rem) // LANE
    p2 = p.reshape(rows, LANE)
    t2 = t.reshape(rows, LANE)

    sub = max(_min_sublane(p2.dtype), _min_sublane(t2.dtype))
    tile_rows = min(MAX_TILE_ROWS, ((rows + sub - 1) // sub) * sub)

    num_blocks = pl.cdiv(rows, tile_rows)
    steps = pl.cdiv(num_blocks, NUM_CORE_SPLITS)

    def in_map(c, i, nrows_ref):
        blk = c * steps + i
        # Clamp so over-range steps (odd block counts / small inputs) re-read
        # an in-bounds block; their rows are masked out inside the kernel.
        return (jnp.minimum(blk, num_blocks - 1), 0)

    partials = pl.pallas_call(
        _dice_kernel,
        out_shape=jax.ShapeDtypeStruct((NUM_CORE_SPLITS, 2, LANE), jnp.float32),
        grid_spec=pltpu.PrefetchScalarGridSpec(
            num_scalar_prefetch=1,
            grid=(NUM_CORE_SPLITS, steps),
            in_specs=[
                pl.BlockSpec((tile_rows, LANE), in_map),
                pl.BlockSpec((tile_rows, LANE), in_map),
            ],
            out_specs=pl.BlockSpec((pl.Squeezed(), 2, LANE),
                                   lambda c, i, nrows_ref: (c, 0, 0)),
        ),
        compiler_params=pltpu.CompilerParams(
            dimension_semantics=("parallel", "arbitrary"),
            vmem_limit_bytes=32 * 1024 * 1024,
        ),
    )(jnp.array([rows], dtype=jnp.int32), p2, t2)

    # Tiny cross-core / cross-lane combine + scalar dice epilogue in XLA.
    intersection = jnp.sum(partials[:, 0, :])
    union = jnp.sum(partials[:, 1, :])
    dice_score = (2.0 * intersection + SMOOTH) / (union + SMOOTH)
    return (1.0 - dice_score).astype(jnp.float32)


def dice_loss_ref(y_pred, y_true):
    p = jnp.reshape(y_pred, (-1,)).astype(jnp.float32)
    t = jnp.reshape(y_true, (-1,)).astype(jnp.float32)
    intersection = jnp.sum(p * t)
    union = jnp.sum(p) + jnp.sum(t)
    return 1.0 - (2.0 * intersection + SMOOTH) / (union + SMOOTH)


if __name__ == "__main__":
    key = jax.random.PRNGKey(0)
    k1, k2 = jax.random.split(key)
    # Typical segmentation shapes: NCHW predictions in [0,1], binary masks.
    y_pred = jax.random.uniform(k1, (2, 4, 16, 16), dtype=jnp.float32)
    y_true = (jax.random.uniform(k2, (2, 4, 16, 16)) > 0.5).astype(jnp.float32)

    loss = dice_loss(y_pred, y_true)
    jax.block_until_ready(loss)

    ref = dice_loss_ref(y_pred, y_true)
    assert jnp.allclose(loss, ref, atol=1e-5, rtol=1e-5), (loss, ref)

    print("KERNEL_OK")
</pallas_src>

<mosaic_0001>
module attributes {stable_mosaic.version = 11 : i64} {
  func.func @_dice_kernel(%arg0: i32, %arg1: i32, %arg2: memref<1xi32, #tpu.memory_space<smem>>, %arg3: memref<16x128xf32, #tpu.memory_space<vmem>>, %arg4: memref<16x128xf32, #tpu.memory_space<vmem>>, %arg5: memref<1x2x128xf32, #tpu.memory_space<vmem>>) attributes {dimension_semantics = [#tpu.dimension_semantics<parallel>, #tpu.dimension_semantics<arbitrary>], iteration_bounds = array<i64: 2, 1>, scalar_prefetch = 1 : i64, scratch_operands = 0 : i64, tpu.core_type = #tpu.core_type<tc>, window_params = [{transform_indices = @transform_0, window_bounds = array<i64: 16, 128>}, {transform_indices = @transform_1, window_bounds = array<i64: 16, 128>}, {transform_indices = @transform_2, window_bounds = array<i64: 1, 2, 128>}]} {
    %c0_i32 = arith.constant 0 : i32
    %0 = arith.cmpi eq, %arg1, %c0_i32 : i32
    %1 = arith.extui %0 : i1 to i32
    %c0_i32_0 = arith.constant 0 : i32
    %2 = arith.cmpi ne, %1, %c0_i32_0 : i32
    scf.if %2 {
      %cst = arith.constant 0.000000e+00 : f32
      %14 = vector.broadcast %cst : f32 to vector<2x128xf32>
      %c0_4 = arith.constant 0 : index
      %c0_5 = arith.constant 0 : index
      %c0_6 = arith.constant 0 : index
      %15 = vector.load %arg5[%c0_4, %c0_5, %c0_6] : memref<1x2x128xf32, #tpu.memory_space<vmem>>, vector<1x2x128xf32>
      %16 = vector.shape_cast %15 : vector<1x2x128xf32> to vector<2x128xf32>
      %17 = vector.shape_cast %14 : vector<2x128xf32> to vector<1x2x128xf32>
      tpu.vector_store %arg5[%c0_4, %c0_5, %c0_6], %17 {strides = array<i32>} : memref<1x2x128xf32, #tpu.memory_space<vmem>>, vector<1x2x128xf32>,
    } else {
    }
    %c0 = arith.constant 0 : index
    %3 = memref.load %arg2[%c0] : memref<1xi32, #tpu.memory_space<smem>>
    %c1_i32 = arith.constant 1 : i32
    %4 = arith.muli %arg0, %c1_i32 : i32
    %5 = arith.addi %4, %arg1 : i32
    %c16_i32 = arith.constant 16 : i32
    %6 = arith.muli %5, %c16_i32 : i32
    %c16_i32_1 = arith.constant 16 : i32
    %7 = arith.addi %6, %c16_i32_1 : i32
    %8 = arith.cmpi sle, %7, %3 : i32
    %9 = arith.extui %8 : i1 to i32
    %c0_i32_2 = arith.constant 0 : i32
    %10 = arith.cmpi ne, %9, %c0_i32_2 : i32
    scf.if %10 {
      %c0_4 = arith.constant 0 : index
      %c0_5 = arith.constant 0 : index
      %14 = vector.load %arg3[%c0_4, %c0_5] : memref<16x128xf32, #tpu.memory_space<vmem>>, vector<16x128xf32>
      %c0_6 = arith.constant 0 : index
      %c0_7 = arith.constant 0 : index
      %15 = vector.load %arg4[%c0_6, %c0_7] : memref<16x128xf32, #tpu.memory_space<vmem>>, vector<16x128xf32>
      %c0_8 = arith.constant 0 : index
      %c0_9 = arith.constant 0 : index
      %c0_10 = arith.constant 0 : index
      %16 = vector.load %arg5[%c0_8, %c0_9, %c0_10] : memref<1x2x128xf32, #tpu.memory_space<vmem>>, vector<1x1x128xf32>
      %17 = vector.shape_cast %16 : vector<1x1x128xf32> to vector<1x128xf32>
      %18 = arith.mulf %14, %15 : vector<16x128xf32>
      %cst = arith.constant dense<0.000000e+00> : vector<128xf32>
      %19 = vector.multi_reduction <add>, %18, %cst [0] : vector<16x128xf32> to vector<128xf32>
      %20 = vector.shape_cast %19 : vector<128xf32> to vector<1x128xf32>
      %21 = arith.addf %17, %20 : vector<1x128xf32>
      %c0_11 = arith.constant 0 : index
      %c0_12 = arith.constant 0 : index
      %c0_13 = arith.constant 0 : index
      %22 = vector.load %arg5[%c0_11, %c0_12, %c0_13] : memref<1x2x128xf32, #tpu.memory_space<vmem>>, vector<1x1x128xf32>
      %23 = vector.shape_cast %22 : vector<1x1x128xf32> to vector<1x128xf32>
      %24 = vector.shape_cast %21 : vector<1x128xf32> to vector<1x1x128xf32>
      tpu.vector_store %arg5[%c0_11, %c0_12, %c0_13], %24 {strides = array<i32>} : memref<1x2x128xf32, #tpu.memory_space<vmem>>, vector<1x1x128xf32>,
      %c0_14 = arith.constant 0 : index
      %c1 = arith.constant 1 : index
      %c0_15 = arith.constant 0 : index
      %25 = vector.load %arg5[%c0_14, %c1, %c0_15] : memref<1x2x128xf32, #tpu.memory_space<vmem>>, vector<1x1x128xf32>
      %26 = vector.shape_cast %25 : vector<1x1x128xf32> to vector<1x128xf32>
      %27 = arith.addf %14, %15 : vector<16x128xf32>
      %cst_16 = arith.constant dense<0.000000e+00> : vector<128xf32>
      %28 = vector.multi_reduction <add>, %27, %cst_16 [0] : vector<16x128xf32> to vector<128xf32>
      %29 = vector.shape_cast %28 : vector<128xf32> to vector<1x128xf32>
      %30 = arith.addf %26, %29 : vector<1x128xf32>
      %c0_17 = arith.constant 0 : index
      %c1_18 = arith.constant 1 : index
      %c0_19 = arith.constant 0 : index
      %31 = vector.load %arg5[%c0_17, %c1_18, %c0_19] : memref<1x2x128xf32, #tpu.memory_space<vmem>>, vector<1x1x128xf32>
      %32 = vector.shape_cast %31 : vector<1x1x128xf32> to vector<1x128xf32>
      %33 = vector.shape_cast %30 : vector<1x128xf32> to vector<1x1x128xf32>
      tpu.vector_store %arg5[%c0_17, %c1_18, %c0_19], %33 {strides = array<i32>} : memref<1x2x128xf32, #tpu.memory_space<vmem>>, vector<1x1x128xf32>,
    } else {
    }
    %true = arith.constant true
    %11 = arith.xori %8, %true : i1
    %12 = arith.extui %11 : i1 to i32
    %c0_i32_3 = arith.constant 0 : i32
    %13 = arith.cmpi ne, %12, %c0_i32_3 : i32
    scf.if %13 {
      %14 = tpu.iota {dimensions = array<i32: 0>} : vector<16x128xi32>
      %15 = vector.broadcast %6 : i32 to vector<16x128xi32>
      %16 = arith.addi %14, %15 : vector<16x128xi32>
      %17 = vector.broadcast %3 : i32 to vector<16x128xi32>
      %18 = arith.cmpi slt, %16, %17 : vector<16x128xi32>
      %c0_4 = arith.constant 0 : index
      %c0_5 = arith.constant 0 : index
      %19 = vector.load %arg3[%c0_4, %c0_5] : memref<16x128xf32, #tpu.memory_space<vmem>>, vector<16x128xf32>
      %cst = arith.constant 0.000000e+00 : f32
      %20 = vector.broadcast %cst : f32 to vector<16x128xf32>
      %21 = arith.select %18, %19, %20 : vector<16x128xi1>, vector<16x128xf32>
      %c0_6 = arith.constant 0 : index
      %c0_7 = arith.constant 0 : index
      %22 = vector.load %arg4[%c0_6, %c0_7] : memref<16x128xf32, #tpu.memory_space<vmem>>, vector<16x128xf32>
      %cst_8 = arith.constant 0.000000e+00 : f32
      %23 = vector.broadcast %cst_8 : f32 to vector<16x128xf32>
      %24 = arith.select %18, %22, %23 : vector<16x128xi1>, vector<16x128xf32>
      %c0_9 = arith.constant 0 : index
      %c0_10 = arith.constant 0 : index
      %c0_11 = arith.constant 0 : index
      %25 = vector.load %arg5[%c0_9, %c0_10, %c0_11] : memref<1x2x128xf32, #tpu.memory_space<vmem>>, vector<1x1x128xf32>
      %26 = vector.shape_cast %25 : vector<1x1x128xf32> to vector<1x128xf32>
      %27 = arith.mulf %21, %24 : vector<16x128xf32>
      %cst_12 = arith.constant dense<0.000000e+00> : vector<128xf32>
      %28 = vector.multi_reduction <add>, %27, %cst_12 [0] : vector<16x128xf32> to vector<128xf32>
      %29 = vector.shape_cast %28 : vector<128xf32> to vector<1x128xf32>
      %30 = arith.addf %26, %29 : vector<1x128xf32>
      %c0_13 = arith.constant 0 : index
      %c0_14 = arith.constant 0 : index
      %c0_15 = arith.constant 0 : index
      %31 = vector.load %arg5[%c0_13, %c0_14, %c0_15] : memref<1x2x128xf32, #tpu.memory_space<vmem>>, vector<1x1x128xf32>
      %32 = vector.shape_cast %31 : vector<1x1x128xf32> to vector<1x128xf32>
      %33 = vector.shape_cast %30 : vector<1x128xf32> to vector<1x1x128xf32>
      tpu.vector_store %arg5[%c0_13, %c0_14, %c0_15], %33 {strides = array<i32>} : memref<1x2x128xf32, #tpu.memory_space<vmem>>, vector<1x1x128xf32>,
      %c0_16 = arith.constant 0 : index
      %c1 = arith.constant 1 : index
      %c0_17 = arith.constant 0 : index
      %34 = vector.load %arg5[%c0_16, %c1, %c0_17] : memref<1x2x128xf32, #tpu.memory_space<vmem>>, vector<1x1x128xf32>
      %35 = vector.shape_cast %34 : vector<1x1x128xf32> to vector<1x128xf32>
      %36 = arith.addf %21, %24 : vector<16x128xf32>
      %cst_18 = arith.constant dense<0.000000e+00> : vector<128xf32>
      %37 = vector.multi_reduction <add>, %36, %cst_18 [0] : vector<16x128xf32> to vector<128xf32>
      %38 = vector.shape_cast %37 : vector<128xf32> to vector<1x128xf32>
      %39 = arith.addf %35, %38 : vector<1x128xf32>
      %c0_19 = arith.constant 0 : index
      %c1_20 = arith.constant 1 : index
      %c0_21 = arith.constant 0 : index
      %40 = vector.load %arg5[%c0_19, %c1_20, %c0_21] : memref<1x2x128xf32, #tpu.memory_space<vmem>>, vector<1x1x128xf32>
      %41 = vector.shape_cast %40 : vector<1x1x128xf32> to vector<1x128xf32>
      %42 = vector.shape_cast %39 : vector<1x128xf32> to vector<1x1x128xf32>
      tpu.vector_store %arg5[%c0_19, %c1_20, %c0_21], %42 {strides = array<i32>} : memref<1x2x128xf32, #tpu.memory_space<vmem>>, vector<1x1x128xf32>,
    } else {
    }
    return
  }
  func.func @transform_0(%arg0: i32, %arg1: i32, %arg2: memref<1xi32, #tpu.memory_space<smem>>) -> (i32, i32) {
    %c1_i32 = arith.constant 1 : i32
    %0 = arith.muli %arg0, %c1_i32 : i32
    %1 = arith.addi %0, %arg1 : i32
    %c0_i32 = arith.constant 0 : i32
    %2 = arith.minsi %1, %c0_i32 : i32
    %c0_i32_0 = arith.constant 0 : i32
    %c0_i32_1 = arith.constant 0 : i32
    return %2, %c0_i32_0 : i32, i32
  }
  func.func @transform_1(%arg0: i32, %arg1: i32, %arg2: memref<1xi32, #tpu.memory_space<smem>>) -> (i32, i32) {
    %c1_i32 = arith.constant 1 : i32
    %0 = arith.muli %arg0, %c1_i32 : i32
    %1 = arith.addi %0, %arg1 : i32
    %c0_i32 = arith.constant 0 : i32
    %2 = arith.minsi %1, %c0_i32 : i32
    %c0_i32_0 = arith.constant 0 : i32
    %c0_i32_1 = arith.constant 0 : i32
    return %2, %c0_i32_0 : i32, i32
  }
  func.func @transform_2(%arg0: i32, %arg1: i32, %arg2: memref<1xi32, #tpu.memory_space<smem>>) -> (i32, i32, i32) {
    %c0_i32 = arith.constant 0 : i32
    %c0_i32_0 = arith.constant 0 : i32
    %c0_i32_1 = arith.constant 0 : i32
    return %arg0, %c0_i32, %c0_i32_0 : i32, i32, i32
  }
}

</mosaic_0001>

<bundles_post_ra>
// kernel: tpu_custom_call.1
= control target key start
LH: loop header
LB: loop body
LE: loop exit
PB: predicated region body
PF: predicated region fallthrough
CT: control target
= control target key end

     0   :  { %s997_s0 = inlined_call_operand.<no memory space> [shape: s32[1], index: 0, kind: input, shape index: {}]   ;;  %s998_s1 = inlined_call_operand.hbm [shape: f32[16,128], index: 1, kind: input, shape index: {}]   ;;  %s999_s2 = inlined_call_operand.hbm [shape: f32[16,128], index: 2, kind: input, shape index: {}]   ;;  %s1000_s3 = inlined_call_operand.hbm [shape: f32[2,2,128], index: 3, kind: output, shape index: {}]  }
   0x1   :  { %8 = sst [smem:[#allocation3]] %s997_s0 }
   0x2   :  { %9 = vsyncpa [#allocation5], 0 }
   0x3   :  { %11 = vsyncpa [#allocation5 + $0x1], 0 }
   0x4   :  { %12 = vsyncpa [#allocation8], 0 }
   0x5   :  { %14 = vsyncpa [#allocation8 + $0x1], 0 }
   0x6   :  { %15 = vsyncpa [#allocation6], 0 }
   0x7   :  { %17 = vsyncpa [#allocation6 + $0x1], 0  ;;  %s758_s14 = smov 0   ;;  %s760_s15 = smov 0  }
   0x8   :  { %s762_s16 = smov 0   ;;  %s764_s17 = smov 0  }
   0x9   :  { %s766_s18 = smov 0   ;;  %s768_s19 = smov 0  }
   0xa   :  { %s770_s20 = smov 0   ;;  %s772_s0 = smov 0  }
   0xb LB: > { %s443_s21 = sadd.s32 4294967295, %s727_s0   ;;  %s444_s22 = sadd.s32 4294967294, %s727_s0   ;;  %s727_s0 = sphi %s772_s0, %s23_s0   ;;  %s723_s20 = sphi %s770_s20, %s1019_s20   ;;  %s719_s19 = sphi %s768_s19, %s1018_s19   ;;  %s715_s18 = sphi %s766_s18, %s987_s18   ;;  %s711_s17 = sphi %s764_s17, %s1017_s17   ;;  %s707_s16 = sphi %s762_s16, %s1016_s16   ;;  %s703_s15 = sphi %s760_s15, %s1015_s15   ;;  %s699_s14 = sphi %s758_s14, %s1014_s14  }
   0xc   : > { %s35_s23 = sadd.s32 1, %s723_s20  ;;  %p696_p1 = scmp.ne.s32.totalorder %s715_s18, 0 }
   0xd   : > { %p37_p0 = scmp.ge.s32.totalorder %s35_s23, 2  ;;  %p56_p2 = scmp.eq.s32.totalorder %s727_s0, 0 }
   0xe   : > { %p61_p3 = scmp.ne.s32.totalorder %s715_s18, %s711_s17  ;;  %p62_p5 = scmp.eq.s32.totalorder %s443_s21, 0 }
   0xf   : > { %s1021_s23 = smov (%p37_p0, %s35_s23), 0  ;;  %p804_p4 = por %p696_p1, %p56_p2 }
  0x10   : > { %p808_p6 = por %p62_p5, %p61_p3  ;;  %s103_s26 = ssub.s32 %s723_s20, %s1021_s23 }
  0x11   : > { %p104_p7 = scmp.eq.s32.totalorder %s103_s26, 0  ;;  %s106_s27 = sadd.s32 1, %s707_s16 }
  0x12   : > { %s1004_s25 = scalar_select %p808_p6, 1, 0 }
  0x13   : > { %s816_s28 = scalar_select %p104_p7, %s707_s16, %s106_s27  }
  0x14   : > { %p116_p8 = scmp.ne.s32.totalorder %s707_s16, %s703_s15  ;;  %p117_p9 = scmp.eq.s32.totalorder %s443_s21, 1 }
  0x15   : > { %p122_p10 = scmp.ne.s32.totalorder %s703_s15, %s699_s14  ;;  %p123_p11 = scmp.eq.s32.totalorder %s444_s22, 1 }
  0x16   : > { %p822_p12 = por %p117_p9, %p116_p8  ;;  %p483_p1 = scmp.lt.s32.totalorder %s727_s0, 2 }
  0x17   : > { %p827_p0 = por %p123_p11, %p122_p10  ;;  %s729_s4 = smov [#allocation4]  }
  0x18   : > { %s1005_s29 = scalar_select %p822_p12, 1, 0 }
  0x19   : > { %s1006_s30 = scalar_select %p827_p0, 1, 0 }
  0x1a   : > { %s157_s5 = sshll.u32 %s729_s4, 4  ;;  %p834_p2 = pnand %p483_p1, %p804_p4  ;;  %s158_s5 = int_to_ptr.vmem [resolvable:$true] %s157_s5 }
  0x1b   : > { %s560_s9 = scalar_lea.hbm %s998_s1, 256 }
  0x1c   : > { %p561_p3 = scmp.ne.s32.totalorder %s998_s1, %s560_s9  ;;  %p562_p5 = pneg %p834_p2 }
  0x1d   : > { %p567_p8 = scmp.lt.u32.totalorder %s560_s9, %s560_s9  ;;  %p569_p9 = scmp.lt.u32.totalorder %s560_s9, %s998_s1 }
  0x1e   : > { %p563_p7 = pnand %p562_p5, %p561_p3 }
  0x1f   : > { %p570_p10 = por %p569_p9, %p567_p8 }
  0x20   : > { %p564_p4 = pneg %p563_p7 }
  0x22   : > { %p571_p11 = pnand %p570_p10, %p564_p4 }
  0x24   : > { %574 = shalt.err (!%p571_p11)
}
  0x25   : > { %s575_s17 = scalar_lea.vmem %s158_s5, 256  ;;  %s582_s21 = scalar_lea.vmem %s158_s5, 512 }
  0x26   : > { %p576_p1 = scmp.ne.s32.totalorder %s158_s5, %s575_s17  ;;  %p583_p12 = scmp.lt.s32.totalorder %s158_s5, %s158_s5 }
  0x27   : > { %p584_p6 = scmp.lt.s32.totalorder %s582_s21, %s575_s17 }
  0x28   : > { %p578_p13 = pnand %p576_p1, %p562_p5 }
  0x29   : > { %p585_p3 = por %p584_p6, %p583_p12 }
  0x2a   : > { %p579_p0 = pneg %p578_p13 }
  0x2c   : > { %p586_p7 = pnand %p585_p3, %p579_p0 }
  0x2e   : > { %589 = shalt.err (!%p586_p7)
}
  0x2f   : > { %s730_s22 = smov 128   ;;  %s731_s24 = smov 8  }
  0x30   : > { %475 = dma.hbm_to_vmem [thread:$0]  (!%p834_p2), %s998_s1, 256, %s158_s5, [#allocation5], %s730_s22, %s730_s22, %s731_s24  }
  0x31   : > { %p453_p13 = scmp.ge.s32.totalorder %s727_s0, 1  ;;  %p189_p4 = scmp.lt.s32.totalorder %s727_s0, 3 }
  0x32   : > { %s732_s7 = smov [#allocation7]   ;;  %s590_s11 = scalar_lea.hbm %s999_s2, 256 }
  0x33   : > { %p865_p8 = pnand %p453_p13, %p189_p4  ;;  %s181_s8 = sshll.u32 %s732_s7, 4  ;;  %s182_s8 = int_to_ptr.vmem [resolvable:$true] %s181_s8 }
  0x34   : > { %p591_p6 = scmp.ne.s32.totalorder %s999_s2, %s590_s11  ;;  %p597_p9 = scmp.lt.u32.totalorder %s590_s11, %s590_s11 }
  0x35   : > { %s1008_s4 = scalar_select %p865_p8, 1, 0 }
  0x36   : > { %p593_p12 = pnand %p591_p6, %p562_p5  ;;  %p599_p10 = scmp.lt.u32.totalorder %s590_s11, %s999_s2 }
  0x38   : > { %p594_p0 = pneg %p593_p12  ;;  %p600_p11 = por %p599_p10, %p597_p9 }
  0x3a   : > { %p601_p1 = pnand %p600_p11, %p594_p0 }
  0x3c   : > { %604 = shalt.err (!%p601_p1)
}
  0x3d   : > { %s605_s21 = scalar_lea.vmem %s182_s8, 256  ;;  %s612_s26 = scalar_lea.vmem %s182_s8, 512 }
  0x3e   : > { %p606_p3 = scmp.ne.s32.totalorder %s182_s8, %s605_s21  ;;  %p613_p4 = scmp.lt.s32.totalorder %s182_s8, %s182_s8 }
  0x3f   : > { %p614_p8 = scmp.lt.s32.totalorder %s612_s26, %s605_s21 }
  0x40   : > { %p608_p7 = pnand %p606_p3, %p562_p5 }
  0x41   : > { %p615_p6 = por %p614_p8, %p613_p4 }
  0x42   : > { %p609_p13 = pneg %p608_p7 }
  0x44   : > { %p616_p12 = pnand %p615_p6, %p609_p13 }
  0x46   : > { %619 = shalt.err (!%p616_p12)
}
  0x47   : > { %478 = dma.hbm_to_vmem [thread:$0]  (!%p834_p2), %s999_s2, 256, %s182_s8, [#allocation8], %s730_s22, %s730_s22, %s731_s24  }
  0x48   : > { %p1009_p0 = scmp.ne.s32.totalorder %s1008_s4, 0 }
  0x49   : > { %s195_s9 = sand.u32 (!%p1009_p0), 1, %s715_s18   ;;  %p1010_p5 = scmp.ne.s32.totalorder (!%p1009_p0), %s1004_s25, 0 }
  0x4a   : > { %193 = sbr.rel (%p1009_p0) target bundleno = 168 (0xa8), region = 28  ;;  %s454_s10 = sshll.u32 (!%p1009_p0), %s195_s9, 4 }
  0x4b   : > { %s196_s11 = scalar_lea.sflag (!%p1009_p0), [#allocation5], %s195_s9  ;;  %s895_s12 = scalar_lea.vmem (!%p1009_p0), [#allocation4], %s454_s10 }
  0x51   : > { %685 = dma.done.wait (%p1010_p5), %s196_s11, 256  }
  0x52   : > { %687 = vsyncadd (%p1010_p5), %s196_s11, 4294967040  ;;  %s205_s6 = scalar_lea.sflag [#allocation8], %s195_s9  ;;  %s901_s13 = scalar_lea.vmem [#allocation7], %s454_s10 }
  0x53   : > { %689 = dma.done.wait (%p1010_p5), %s205_s6, 256  }
  0x54   : > { %691 = vsyncadd (%p1010_p5), %s205_s6, 4294967040  ;;  %s231_s22 = sand.u32 1, %s703_s15   ;;  %s457_s24 = sshll.u32 %s719_s19, 4  ;;  %v733_v0 = vmov 0.0  }
  0x55   : > { %s909_s4 = sld [smem:[#allocation3]]  ;;  %s456_s8 = sshll.u32 %s231_s22, 1 }
  0x56   : > { %s915_s5 = sadd.s32 16, %s457_s24  ;;  %s917_s17 = scalar_lea.vmem [#allocation9], %s456_s8 }
  0x57   : > { %246 = vst [vmem:[%s917_s17] sm:$0x3] %v733_v0 }
  0x5b   : > { %p458_p2 = scmp.gt.s32.totalorder %s915_s5, %s909_s4 }
  0x5c   : > { %v255_v1 = vld [vmem:[%s895_s12] sm:$0xff] (!%p458_p2)  ;;  %v256_v2 = vld [vmem:[%s895_s12 + $0x8] sm:$0xff] (!%p458_p2) }
  0x5d   : > { %254 = sbr.rel (%p458_p2) target bundleno = 113 (0x71), region = 44  ;;  %v257_v3 = vld [vmem:[%s901_s13] sm:$0xff] (!%p458_p2)  ;;  %v258_v4 = vld [vmem:[%s901_s13 + $0x8] sm:$0xff] (!%p458_p2) }
  0x5e   : > { %v260_v5 = vmul.f32 (!%p458_p2), %v257_v3, %v255_v1  ;;  %v272_v6 = vadd.f32 (!%p458_p2), %v257_v3, %v255_v1  ;;  %v261_v7 = vmul.f32 (!%p458_p2), %v258_v4, %v256_v2  ;;  %v273_v8 = vadd.f32 (!%p458_p2), %v258_v4, %v256_v2  ;;  %v259_v21 = vld [vmem:[%s917_s17] sm:$0x1] (!%p458_p2)  ;;  %v271_v22 = vld [vmem:[%s917_s17 + $0x1] sm:$0x1] (!%p458_p2) }
  0x60   : > { %v262_v9 = vadd.f32 (!%p458_p2), %v261_v7, %v260_v5  ;;  %v274_v10 = vadd.f32 (!%p458_p2), %v273_v8, %v272_v6 }
  0x62   : > { %v263_v11 = vrot.slane (!%p458_p2), %v262_v9, 4  ;;  %v275_v12 = vrot.slane (!%p458_p2), %v274_v10, 4 }
  0x64   : > { %v264_v13 = vadd.f32 %v263_v11, %v262_v9  ;;  %v276_v14 = vadd.f32 %v275_v12, %v274_v10 }
  0x66   : > { %v265_v15 = vrot.slane %v264_v13, 2  ;;  %v277_v16 = vrot.slane %v276_v14, 2 }
  0x68   : > { %v266_v17 = vadd.f32 %v265_v15, %v264_v13  ;;  %v278_v18 = vadd.f32 %v277_v16, %v276_v14 }
  0x6a   : > { %v267_v19 = vrot.slane %v266_v17, 1  ;;  %v279_v20 = vrot.slane %v278_v18, 1 }
  0x6c   : > { %v268_v23 = vadd.f32 %v267_v19, %v266_v17  ;;  %v280_v24 = vadd.f32 %v279_v20, %v278_v18 }
  0x6e   : > { %v269_v25 = vadd.f32 %v268_v23, %v259_v21  ;;  %v281_v26 = vadd.f32 %v280_v24, %v271_v22 }
  0x70   : > { %270 = vst [vmem:[%s917_s17] sm:$0x1] %v269_v25  ;;  %282 = vst [vmem:[%s917_s17 + $0x1] sm:$0x1] %v281_v26 }
  0x71 PF: > { %p459_p8 = scmp.le.s32.totalorder %s915_s5, %s909_s4 }
  0x72   : > { %v287_v27 = vlaneseq (!%p459_p8)  ;;  %v290_v28 = vstv (!%p459_p8), %s457_s24  ;;  %v293_v30 = vstv (!%p459_p8), %s909_s4  ;;  %v296_v33 = vld [vmem:[%s895_s12] sm:$0xff] (!%p459_p8)  ;;  %v297_v36 = vld [vmem:[%s895_s12 + $0x8] sm:$0xff] (!%p459_p8) }
  0x73   : > { %286 = sbr.rel (%p459_p8) target bundleno = 143 (0x8f), region = 48  ;;  %v300_v34 = vld [vmem:[%s901_s13] sm:$0xff] (!%p459_p8)  ;;  %v301_v37 = vld [vmem:[%s901_s13 + $0x8] sm:$0xff] (!%p459_p8) }
  0x74   : > { %v288_v29 = vshrl.u32 (!%p459_p8), %v287_v27, 7 }
  0x76   : > { %v289_v31 = vadd.s32 (!%p459_p8), 8, %v288_v29  ;;  %v291_v32 = vadd.s32 (!%p459_p8), %v290_v28, %v288_v29 }
  0x77   : > { %v304_v58 = vld [vmem:[%s917_s17] sm:$0x1] (!%p459_p8)  ;;  %v316_v59 = vld [vmem:[%s917_s17 + $0x1] sm:$0x1] (!%p459_p8) }
  0x78   : > { %v292_v35 = vadd.s32 (!%p459_p8), %v290_v28, %v289_v31  ;;  %vm294_vm0 = vcmp.lt.s32.totalorder (!%p459_p8), %v291_v32, %v293_v30 }
  0x79   : > { %v298_v38 = vsel (!%p459_p8), %vm294_vm0, %v296_v33, 0.0  ;;  %v302_v39 = vsel (!%p459_p8), %vm294_vm0, %v300_v34, 0.0 }
  0x7a   : > { %vm295_vm1 = vcmp.lt.s32.totalorder %v292_v35, %v293_v30  ;;  %v305_v40 = vmul.f32 %v302_v39, %v298_v38  ;;  %v317_v41 = vadd.f32 %v302_v39, %v298_v38 }
  0x7b   : > { %v299_v42 = vsel %vm295_vm1, %v297_v36, 0.0  ;;  %v303_v43 = vsel %vm295_vm1, %v301_v37, 0.0 }
  0x7c   : > { %v306_v44 = vmul.f32 %v303_v43, %v299_v42  ;;  %v318_v45 = vadd.f32 %v303_v43, %v299_v42 }
  0x7e   : > { %v307_v46 = vadd.f32 %v306_v44, %v305_v40  ;;  %v319_v47 = vadd.f32 %v318_v45, %v317_v41 }
  0x80   : > { %v308_v48 = vrot.slane %v307_v46, 4  ;;  %v320_v49 = vrot.slane %v319_v47, 4 }
  0x82   : > { %v309_v50 = vadd.f32 %v308_v48, %v307_v46  ;;  %v321_v51 = vadd.f32 %v320_v49, %v319_v47 }
  0x84   : > { %v310_v52 = vrot.slane %v309_v50, 2  ;;  %v322_v53 = vrot.slane %v321_v51, 2 }
  0x86   : > { %v311_v54 = vadd.f32 %v310_v52, %v309_v50  ;;  %v323_v55 = vadd.f32 %v322_v53, %v321_v51 }
  0x88   : > { %v312_v56 = vrot.slane %v311_v54, 1  ;;  %v324_v57 = vrot.slane %v323_v55, 1 }
  0x8a   : > { %v313_v60 = vadd.f32 %v312_v56, %v311_v54  ;;  %v325_v61 = vadd.f32 %v324_v57, %v323_v55 }
  0x8c   : > { %v314_v62 = vadd.f32 %v313_v60, %v304_v58  ;;  %v326_v63 = vadd.f32 %v325_v61, %v316_v59 }
  0x8e   : > { %315 = vst [vmem:[%s917_s17] sm:$0x1] %v314_v62  ;;  %327 = vst [vmem:[%s917_s17 + $0x1] sm:$0x1] %v326_v63 }
  0x8f PF: > { %s461_s25 = sshll.u32 %s719_s19, 5  ;;  %s342_s7 = sshll.u32 %s917_s17, 4  ;;  %s343_s7 = int_to_ptr.vmem [resolvable:$true] %s342_s7 }
  0x90   : > { %s947_s27 = scalar_lea.hbm %s1000_s3, %s461_s25  ;;  %s329_s9 = scalar_lea.sflag [#allocation6], %s231_s22 }
  0x91   : > { %s620_s10 = scalar_lea.vmem %s343_s7, 32  ;;  %p1011_p10 = scmp.ne.s32.totalorder %s1005_s29, 0 }
  0x92   : > { %p621_p9 = scmp.ne.s32.totalorder %s343_s7, %s620_s10  ;;  %s734_s11 = smov [#allocation9]  }
  0x93   : > { %s624_s12 = sshll.u32 %s734_s11, 4  ;;  %s625_s12 = int_to_ptr.vmem [resolvable:$false] %s624_s12 }
  0x94   : > { %p622_p11 = pnand %p621_p9, %p1011_p10  ;;  %s626_s6 = scalar_lea.vmem %s625_s12, 64 }
  0x95   : > { %p627_p3 = scmp.lt.s32.totalorder %s343_s7, %s625_s12  ;;  %p628_p7 = scmp.lt.s32.totalorder %s626_s6, %s620_s10 }
  0x96   : > { %p623_p1 = pneg %p622_p11 }
  0x97   : > { %p629_p13 = por %p628_p7, %p627_p3 }
  0x99   : > { %p630_p4 = pnand %p629_p13, %p623_p1 }
  0x9b   : > { %633 = shalt.err (!%p630_p4)
}
  0x9c   : > { %s634_s19 = scalar_lea.hbm %s947_s27, 32  ;;  %s638_s24 = scalar_lea.hbm %s1000_s3, 64 }
  0x9d   : > { %p635_p6 = scmp.ne.s32.totalorder %s947_s27, %s634_s19  ;;  %p639_p5 = scmp.lt.u32.totalorder %s947_s27, %s1000_s3 }
  0x9e   : > { %p640_p2 = scmp.lt.u32.totalorder %s638_s24, %s634_s19  ;;  %p642_p9 = scmp.lt.u32.totalorder %s634_s19, %s947_s27 }
  0x9f   : > { %p636_p12 = pnand %p635_p6, %p1011_p10 }
  0xa0   : > { %p641_p8 = por %p640_p2, %p639_p5 }
  0xa1   : > { %p637_p0 = pneg %p636_p12 }
  0xa2   : > { %p643_p11 = por %p642_p9, %p641_p8 }
  0xa4   : > { %p644_p1 = pnand %p643_p11, %p637_p0 }
  0xa6   : > { %647 = shalt.err (!%p644_p1)
}
  0xa7   : > { %470 = dma.vmem_to_hbm [thread:$0]  (%p1011_p10), %s343_s7, 32, %s947_s27, %s329_s9  }
  0xa8 PF: > { %s354_s5 = sand.u32 1, %s699_s14   ;;  %p1012_p3 = scmp.ne.s32.totalorder %s1006_s30, 0 }
  0xa9   : > { %p1013_p7 = scmp.ge.s32.totalorder %s727_s0, 2  ;;  %s355_s17 = scalar_lea.sflag [#allocation6], %s354_s5 }
  0xab   : > { %p480_p13 = pnand %p1013_p7, %p1012_p3 }
  0xad   : > { %693 = dma.done.wait (!%p480_p13), %s355_s17, 32  }
  0xae   : > { %695 = vsyncadd (!%p480_p13), %s355_s17, 4294967264  ;;  %s23_s0 = sadd.s32 1, %s727_s0   ;;  %s1014_s14 = smov %s703_s15 }
  0xaf   : > { %p20_p4 = scmp.ge.s32.totalorder %s23_s0, 4   ;;  %s1015_s15 = smov %s707_s16 }
  0xb0   : > { %s1016_s16 = smov %s816_s28  ;;  %s1017_s17 = smov %s715_s18 }
  0xb1   : > { %s987_s18 = smov 0   ;;  %s1018_s19 = smov %s723_s20 }
  0xb2   : > { %s1019_s20 = smov %s1021_s23  ;;  %22 = sbr.rel (!%p20_p4) target bundleno = 11 (0xb), region = 98 }
  0xb9   :  { %360 = vsyncpa [#allocation5], 1 }
  0xba   :  { %362 = vsyncpa [#allocation5 + $0x1], 1 }
  0xbb   :  { %363 = vsyncpa [#allocation8], 1 }
  0xbc   :  { %365 = vsyncpa [#allocation8 + $0x1], 1 }
  0xbd   :  { %366 = vsyncpa [#allocation6], 1 }
  0xbe   :  { %368 = vsyncpa [#allocation6 + $0x1], 1 }

</bundles_post_ra>
